<compile_context>
chip_gen: v7x
topology: tpu7x:2x2x1
jax: 0.10.0
libtpu: 0.0.40
codegen_flags: <defaults>
</compile_context>

<pallas_src>
import functools

import jax
import jax.numpy as jnp
from jax import lax
from jax.experimental import pallas as pl
from jax.experimental.pallas import tpu as pltpu


def _round_up(x, m):
    return ((x + m - 1) // m) * m


def churn_mlp_kernel(x_ref, w1_ref, b1_ref, w2_ref, b2_ref, w3_ref, b3_ref,
                     o_ref):
    """One batch tile: x (TB, 12) -> out (1, TB); batch on lanes after L1."""
    # bf16 operands for the MXU, f32 accumulation.
    x = x_ref[...].astype(jnp.bfloat16)                               # (TB, 12)

    # H1 = relu(W1 @ X^T + b1): contract the 12-dim of both operands so the
    # batch ends up on the lane axis without any HBM-side transpose.
    h1 = lax.dot_general(w1_ref[...], x, (((1,), (1,)), ((), ())),
                         preferred_element_type=jnp.float32)          # (64, TB)
    h1 = jnp.maximum(h1 + b1_ref[...], 0.0)

    h2 = jnp.dot(w2_ref[...], h1.astype(jnp.bfloat16),
                 preferred_element_type=jnp.float32)                  # (32, TB)
    h2 = jnp.maximum(h2 + b2_ref[...], 0.0)

    # Final layer (1, 32) @ (32, TB): an M=1 MXU matmul wastes the array, so
    # use broadcast-multiply + sublane reduce on otherwise-idle VPU/XLU slots.
    logits = jnp.sum(w3_ref[...] * h2, axis=0, keepdims=True) + b3_ref[...]
    o_ref[...] = jax.nn.sigmoid(logits).astype(o_ref.dtype)           # (1, TB)


@functools.partial(jax.jit, static_argnames=("block_b",))
def churn_forward(x, params, *, block_b=16384):
    """x: (B, 12) float; params in PyTorch layout:
    w1 (64,12), b1 (64,), w2 (32,64), b2 (32,), w3 (1,32), b3 (1,)."""
    w1, b1, w2, b2, w3, b3 = params
    B = x.shape[0]

    # Column-vector biases broadcast along the lane (batch) axis.
    b1c = b1.reshape(64, 1).astype(jnp.float32)
    b2c = b2.reshape(32, 1).astype(jnp.float32)
    b3c = b3.reshape(1, 1).astype(jnp.float32)
    w3c = w3.reshape(32, 1).astype(jnp.float32)   # VPU/XLU path -> keep f32
    w1b = w1.astype(jnp.bfloat16)                 # MXU operands in bf16
    w2b = w2.astype(jnp.bfloat16)

    # Batch tile: large enough to amortize per-grid-step overhead, small
    # enough that cdiv(B, tb) >= ~4 so v7x megacore gets balanced work.
    if B < 128:
        tb = B                                    # one block == full array dims
    else:
        tb = min(block_b, _round_up(-(-B // 4), 128))
        tb = max(tb, 128)
    num_tiles = -(-B // tb)                       # ragged tail handled by Pallas

    x32 = x.astype(jnp.float32)

    flops = 2 * (12 * 64 + 64 * 32 + 32) * B
    bytes_accessed = (12 * 4 + 4) * B + 2 * (64 * 12 + 32 * 64 + 32) + 4 * (64 + 32 + 1)

    grid_spec = pltpu.PrefetchScalarGridSpec(
        num_scalar_prefetch=0,
        grid=(num_tiles,),
        in_specs=[
            pl.BlockSpec((tb, 12), lambda i: (i, 0)),    # x tile, streamed
            pl.BlockSpec((64, 12), lambda i: (0, 0)),    # W1 (bf16), resident
            pl.BlockSpec((64, 1), lambda i: (0, 0)),     # b1, resident
            pl.BlockSpec((32, 64), lambda i: (0, 0)),    # W2 (bf16), resident
            pl.BlockSpec((32, 1), lambda i: (0, 0)),     # b2, resident
            pl.BlockSpec((32, 1), lambda i: (0, 0)),     # W3 column, resident
            pl.BlockSpec((1, 1), lambda i: (0, 0)),      # b3, resident
        ],
        out_specs=pl.BlockSpec((1, tb), lambda i: (0, i)),
    )

    out_t = pl.pallas_call(
        churn_mlp_kernel,
        out_shape=jax.ShapeDtypeStruct((1, B), jnp.float32),
        grid_spec=grid_spec,
        compiler_params=pltpu.CompilerParams(
            # Independent batch tiles -> megacore-shardable on v7x.
            dimension_semantics=("parallel",),
            # tb=16384 f32 x-tile occupies ~8 MiB in VMEM (lane-padded to 128),
            # x2 buffers + output + weights ~= 17.5 MiB.  48 MiB leaves
            # headroom and stays under v7x's 64 MiB physical VMEM.
            vmem_limit_bytes=48 * 1024 * 1024,
        ),
        cost_estimate=pl.CostEstimate(flops=flops, transcendentals=B,
                                      bytes_accessed=bytes_accessed),
        # TODO(synk): if a profile shows exposed x DMA at tile boundaries, add
        # pipeline_mode=pl.Buffered(3) on the x BlockSpec only.
    )(x32, w1b, b1c, w2b, b2c, w3c, b3c)

    # Metadata-only reshape (output is already (1, B) with batch on lanes).
    return out_t.reshape(B, 1)


def init_params(key):
    """PyTorch nn.Linear default init: U(-1/sqrt(fan_in), +1/sqrt(fan_in)),
    weights stored (out_features, in_features) like PyTorch."""
    def linear(key, fan_in, fan_out):
        kw, kb = jax.random.split(key)
        bound = 1.0 / jnp.sqrt(fan_in)
        w = jax.random.uniform(kw, (fan_out, fan_in), jnp.float32, -bound, bound)
        b = jax.random.uniform(kb, (fan_out,), jnp.float32, -bound, bound)
        return w, b

    k1, k2, k3 = jax.random.split(key, 3)
    w1, b1 = linear(k1, 12, 64)
    w2, b2 = linear(k2, 64, 32)
    w3, b3 = linear(k3, 32, 1)
    return (w1, b1, w2, b2, w3, b3)


def reference_forward(x, params):
    w1, b1, w2, b2, w3, b3 = params
    h1 = jnp.maximum(x @ w1.T + b1, 0.0)
    h2 = jnp.maximum(h1 @ w2.T + b2, 0.0)
    return jax.nn.sigmoid(h2 @ w3.T + b3)


if __name__ == "__main__":
    key = jax.random.PRNGKey(0)
    kx, kp = jax.random.split(key)

    params = init_params(kp)

    # Small batch: single block equal to the full array (no padding path).
    B = 8
    x = jax.random.normal(kx, (B, 12), jnp.float32)
    out = jax.block_until_ready(churn_forward(x, params))
    ref = reference_forward(x, params)
    assert out.shape == (B, 1), out.shape
    # bf16 MXU operands (f32 accumulation) -> allow ~1e-2 absolute slack.
    assert jnp.allclose(out, ref, atol=1e-2, rtol=0.0), float(
        jnp.max(jnp.abs(out - ref)))

    # Larger, non-multiple-of-128 batch: exercises multi-tile grid + ragged
    # tail block (no host-side pad; OOB output columns are discarded).
    B2 = 300
    x2 = jax.random.normal(kx, (B2, 12), jnp.float32)
    out2 = jax.block_until_ready(churn_forward(x2, params, block_b=128))
    ref2 = reference_forward(x2, params)
    assert out2.shape == (B2, 1), out2.shape
    assert jnp.allclose(out2, ref2, atol=1e-2, rtol=0.0), float(
        jnp.max(jnp.abs(out2 - ref2)))

    print("KERNEL_OK")
</pallas_src>

<mosaic_0001>
module attributes {stable_mosaic.version = 11 : i64} {
  func.func @churn_mlp_kernel(%arg0: i32, %arg1: memref<8x12xf32, #tpu.memory_space<vmem>>, %arg2: memref<64x12xbf16, #tpu.memory_space<vmem>>, %arg3: memref<64x1xf32, #tpu.memory_space<vmem>>, %arg4: memref<32x64xbf16, #tpu.memory_space<vmem>>, %arg5: memref<32x1xf32, #tpu.memory_space<vmem>>, %arg6: memref<32x1xf32, #tpu.memory_space<vmem>>, %arg7: memref<1x1xf32, #tpu.memory_space<vmem>>, %arg8: memref<1x8xf32, #tpu.memory_space<vmem>>) attributes {dimension_semantics = [#tpu.dimension_semantics<parallel>], iteration_bounds = array<i64: 1>, scalar_prefetch = 0 : i64, scratch_operands = 0 : i64, tpu.core_type = #tpu.core_type<tc>, window_params = [{transform_indices = @transform_0, window_bounds = array<i64: 8, 12>}, {pipeline_mode = #tpu.pipeline_mode<synchronous>, transform_indices = @transform_1, window_bounds = array<i64: 64, 12>}, {pipeline_mode = #tpu.pipeline_mode<synchronous>, transform_indices = @transform_2, window_bounds = array<i64: 64, 1>}, {pipeline_mode = #tpu.pipeline_mode<synchronous>, transform_indices = @transform_3, window_bounds = array<i64: 32, 64>}, {pipeline_mode = #tpu.pipeline_mode<synchronous>, transform_indices = @transform_4, window_bounds = array<i64: 32, 1>}, {pipeline_mode = #tpu.pipeline_mode<synchronous>, transform_indices = @transform_5, window_bounds = array<i64: 32, 1>}, {pipeline_mode = #tpu.pipeline_mode<synchronous>, transform_indices = @transform_6, window_bounds = array<i64: 1, 1>}, {transform_indices = @transform_7, window_bounds = array<i64: 1, 8>}]} {
    %c0 = arith.constant 0 : index
    %c0_0 = arith.constant 0 : index
    %0 = vector.load %arg1[%c0, %c0_0] : memref<8x12xf32, #tpu.memory_space<vmem>>, vector<8x12xf32>
    %1 = arith.truncf %0 : vector<8x12xf32> to vector<8x12xbf16>
    %c0_1 = arith.constant 0 : index
    %c0_2 = arith.constant 0 : index
    %2 = vector.load %arg2[%c0_1, %c0_2] : memref<64x12xbf16, #tpu.memory_space<vmem>>, vector<64x12xbf16>
    %cst = arith.constant dense<0.000000e+00> : vector<64x8xf32>
    %3 = tpu.matmul %2, %1, %cst {dimension_numbers = #tpu.dot_dimension_numbers<[1], [1], [0], [0], [0, 0, 1, 0], [], []>} : vector<64x12xbf16>, vector<8x12xbf16>, vector<64x8xf32> -> vector<64x8xf32>
    %c0_3 = arith.constant 0 : index
    %c0_4 = arith.constant 0 : index
    %4 = vector.load %arg3[%c0_3, %c0_4] : memref<64x1xf32, #tpu.memory_space<vmem>>, vector<64x1xf32>
    %5 = vector.broadcast %4 : vector<64x1xf32> to vector<64x8xf32>
    %6 = arith.addf %3, %5 : vector<64x8xf32>
    %cst_5 = arith.constant 0.000000e+00 : f32
    %7 = vector.broadcast %cst_5 : f32 to vector<64x8xf32>
    %8 = arith.maximumf %6, %7 : vector<64x8xf32>
    %c0_6 = arith.constant 0 : index
    %c0_7 = arith.constant 0 : index
    %9 = vector.load %arg4[%c0_6, %c0_7] : memref<32x64xbf16, #tpu.memory_space<vmem>>, vector<32x64xbf16>
    %10 = arith.truncf %8 : vector<64x8xf32> to vector<64x8xbf16>
    %cst_8 = arith.constant dense<0.000000e+00> : vector<32x8xf32>
    %11 = tpu.matmul %9, %10, %cst_8 {dimension_numbers = #tpu.dot_dimension_numbers<[1], [0], [0], [1], [0, 0, 1, 1], [], []>} : vector<32x64xbf16>, vector<64x8xbf16>, vector<32x8xf32> -> vector<32x8xf32>
    %c0_9 = arith.constant 0 : index
    %c0_10 = arith.constant 0 : index
    %12 = vector.load %arg5[%c0_9, %c0_10] : memref<32x1xf32, #tpu.memory_space<vmem>>, vector<32x1xf32>
    %13 = vector.broadcast %12 : vector<32x1xf32> to vector<32x8xf32>
    %14 = arith.addf %11, %13 : vector<32x8xf32>
    %cst_11 = arith.constant 0.000000e+00 : f32
    %15 = vector.broadcast %cst_11 : f32 to vector<32x8xf32>
    %16 = arith.maximumf %14, %15 : vector<32x8xf32>
    %c0_12 = arith.constant 0 : index
    %c0_13 = arith.constant 0 : index
    %17 = vector.load %arg6[%c0_12, %c0_13] : memref<32x1xf32, #tpu.memory_space<vmem>>, vector<32x1xf32>
    %18 = vector.broadcast %17 : vector<32x1xf32> to vector<32x8xf32>
    %19 = arith.mulf %18, %16 : vector<32x8xf32>
    %cst_14 = arith.constant dense<0.000000e+00> : vector<8xf32>
    %20 = vector.multi_reduction <add>, %19, %cst_14 [0] : vector<32x8xf32> to vector<8xf32>
    %21 = vector.shape_cast %20 : vector<8xf32> to vector<1x8xf32>
    %c0_15 = arith.constant 0 : index
    %c0_16 = arith.constant 0 : index
    %22 = vector.load %arg7[%c0_15, %c0_16] : memref<1x1xf32, #tpu.memory_space<vmem>>, vector<1x1xf32>
    %23 = vector.broadcast %22 : vector<1x1xf32> to vector<1x8xf32>
    %24 = arith.addf %21, %23 : vector<1x8xf32>
    %25 = arith.negf %24 : vector<1x8xf32>
    %26 = math.exp %25 : vector<1x8xf32>
    %cst_17 = arith.constant 1.000000e+00 : f32
    %27 = vector.broadcast %cst_17 : f32 to vector<1x8xf32>
    %28 = arith.addf %27, %26 : vector<1x8xf32>
    %29 = arith.divf %27, %28 : vector<1x8xf32>
    %c0_18 = arith.constant 0 : index
    %c0_19 = arith.constant 0 : index
    %30 = vector.load %arg8[%c0_18, %c0_19] : memref<1x8xf32, #tpu.memory_space<vmem>>, vector<1x8xf32>
    tpu.vector_store %arg8[%c0_18, %c0_19], %29 {strides = array<i32>} : memref<1x8xf32, #tpu.memory_space<vmem>>, vector<1x8xf32>,
    return
  }
  func.func @transform_0(%arg0: i32) -> (i32, i32) {
    %c0_i32 = arith.constant 0 : i32
    %c0_i32_0 = arith.constant 0 : i32
    return %arg0, %c0_i32 : i32, i32
  }
  func.func @transform_1(%arg0: i32) -> (i32, i32) {
    %c0_i32 = arith.constant 0 : i32
    %c0_i32_0 = arith.constant 0 : i32
    %c0_i32_1 = arith.constant 0 : i32
    return %c0_i32, %c0_i32_0 : i32, i32
  }
  func.func @transform_2(%arg0: i32) -> (i32, i32) {
    %c0_i32 = arith.constant 0 : i32
    %c0_i32_0 = arith.constant 0 : i32
    %c0_i32_1 = arith.constant 0 : i32
    return %c0_i32, %c0_i32_0 : i32, i32
  }
  func.func @transform_3(%arg0: i32) -> (i32, i32) {
    %c0_i32 = arith.constant 0 : i32
    %c0_i32_0 = arith.constant 0 : i32
    %c0_i32_1 = arith.constant 0 : i32
    return %c0_i32, %c0_i32_0 : i32, i32
  }
  func.func @transform_4(%arg0: i32) -> (i32, i32) {
    %c0_i32 = arith.constant 0 : i32
    %c0_i32_0 = arith.constant 0 : i32
    %c0_i32_1 = arith.constant 0 : i32
    return %c0_i32, %c0_i32_0 : i32, i32
  }
  func.func @transform_5(%arg0: i32) -> (i32, i32) {
    %c0_i32 = arith.constant 0 : i32
    %c0_i32_0 = arith.constant 0 : i32
    %c0_i32_1 = arith.constant 0 : i32
    return %c0_i32, %c0_i32_0 : i32, i32
  }
  func.func @transform_6(%arg0: i32) -> (i32, i32) {
    %c0_i32 = arith.constant 0 : i32
    %c0_i32_0 = arith.constant 0 : i32
    %c0_i32_1 = arith.constant 0 : i32
    return %c0_i32, %c0_i32_0 : i32, i32
  }
  func.func @transform_7(%arg0: i32) -> (i32, i32) {
    %c0_i32 = arith.constant 0 : i32
    %c0_i32_0 = arith.constant 0 : i32
    return %c0_i32, %arg0 : i32, i32
  }
}

</mosaic_0001>

<bundles_post_ra>
// kernel: churn_forward.1
= control target key start
LH: loop header
LB: loop body
LE: loop exit
PB: predicated region body
PF: predicated region fallthrough
CT: control target
= control target key end

     0   :  { %s593_s0 = inlined_call_operand.vmem [shape: f32[8,12], index: 0, kind: input, shape index: {}]   ;;  %s594_s1 = inlined_call_operand.vmem [shape: bf16[64,12], index: 1, kind: input, shape index: {}]   ;;  %s595_s2 = inlined_call_operand.vmem [shape: f32[64,1], index: 2, kind: input, shape index: {}]   ;;  %s596_s3 = inlined_call_operand.vmem [shape: bf16[32,64], index: 3, kind: input, shape index: {}]   ;;  %s597_s4 = inlined_call_operand.vmem [shape: f32[32,1], index: 4, kind: input, shape index: {}]   ;;  %s598_s5 = inlined_call_operand.vmem [shape: f32[32,1], index: 5, kind: input, shape index: {}]   ;;  %s599_s6 = inlined_call_operand.<no memory space> [shape: f32[1,1], index: 6, kind: input, shape index: {}]   ;;  %s600_s7 = inlined_call_operand.hbm [shape: f32[1,8], index: 7, kind: output, shape index: {}]  }
   0x1   :  { %v12_v0 = vstv %s599_s6 }
   0x2   :  { %13 = vst [vmem:[#allocation2] sm:$0x1] %v12_v0 }
   0x3   :  { %v30_v1 = vld [vmem:[%s593_s0] sm:$0xff]  ;;  %vm108_vm0 = vcmask 97280   ;;  %v459_v4 = vmov 0   ;;  %v42_v7 = vld [vmem:[%s595_s2 + $0x10] sm:$0xff]  ;;  %v41_v8 = vld [vmem:[%s595_s2 + $0x8] sm:$0xff] }
   0x4   :  { %v31_v2 = vpack.c.bf16 %v30_v1, %v30_v1  ;;  %v425_v3 = vld [vmem:[%s594_s1] sm:$0xff]   ;;  %423 = vset.pattern.permute.xlu0 %v459_v4  ;;  %424 = vset.pattern.permute.xlu1 %v459_v4  ;;  %v426_v9 = vld [vmem:[%s594_s1 + $0x8] sm:$0xff]   ;;  %v43_v10 = vld [vmem:[%s595_s2 + $0x18] sm:$0xff] }
   0x5   :  { %400 = vmatprep.mubr.msk.bf16.mxu0 %vm108_vm0, %v425_v3  ;;  %v40_v6 = vld [vmem:[%s595_s2] sm:$0xff]  ;;  %60 = vperm.xlu1 %424, %v42_v7   ;;  %v427_v11 = vld [vmem:[%s594_s1 + $0x10] sm:$0xff]   ;;  %v45_v13 = vld [vmem:[%s595_s2 + $0x28] sm:$0xff] }
   0x6   :  { %420 = vmatprep.subr.msk.bf16.mxu0 %vm108_vm0, %v31_v2  ;;  %v122_v5 = vsel %vm108_vm0, %v31_v2, 0  ;;  %50 = vperm.xlu0 %423, %v40_v6   ;;  %v44_v12 = vld [vmem:[%s595_s2 + $0x20] sm:$0xff] }
   0x7   :  { %399 = vmatpush3.bf16.xpose.msra.mxu0 %v122_v5 }
   0x9   :  { %65 = vperm.xlu1 %424, %v43_v10  }
   0xa   :  { %55 = vperm.xlu0 %423, %v41_v8  }
   0xe   :  { %401 = vmatmul.mubr.msk.bf16.vlgmr.msra.gmra.mrb[0].mxu0 %vm108_vm0, %v426_v9 }
   0xf   :  { %14 = vsyncpa [#allocation4], 0  ;;  %404 = vmatprep.mubr.msk.bf16.mxu0 %vm108_vm0, %v427_v11  ;;  %70 = vperm.xlu0 %423, %v44_v12   ;;  %v46_v14 = vld [vmem:[%s595_s2 + $0x30] sm:$0xff]  ;;  %v428_v15 = vld [vmem:[%s594_s1 + $0x18] sm:$0xff]   ;;  %vm239_vm1 = vcmask 523264   ;;  %vm327_vm2 = vcmask 64512  }
  0x10   :  { %75 = vperm.xlu1 %424, %v45_v13   ;;  %v47_v16 = vld [vmem:[%s595_s2 + $0x38] sm:$0xff]  ;;  %v205_v17 = vld [vmem:[%s597_s4] sm:$0xff]  ;;  %v206_v18 = vld [vmem:[%s597_s4 + $0x8] sm:$0xff]  ;;  %vm358_vm3 = vcmask 57344  }
  0x11   :  { %v207_v19 = vld [vmem:[%s597_s4 + $0x10] sm:$0xff]  ;;  %v208_v20 = vld [vmem:[%s597_s4 + $0x18] sm:$0xff]  ;;  %v299_v21 = vld [vmem:[%s598_s5] sm:$0xff] }
  0x12   :  { %v300_v22 = vld [vmem:[%s598_s5 + $0x8] sm:$0xff]  ;;  %v301_v23 = vld [vmem:[%s598_s5 + $0x10] sm:$0xff]  ;;  %v302_v24 = vld [vmem:[%s598_s5 + $0x18] sm:$0xff] }
  0x13   :  { %80 = vperm.xlu0 %423, %v46_v14   ;;  %v341_v25 = vld [vmem:[#allocation2] sm:$0x1]  ;;  %v430_v63 = vld [vmem:[%s596_s3 + $0x8] sm:$0xff]  }
  0x14   :  { %85 = vperm.xlu1 %424, %v47_v16   ;;  %v429_v26 = vld [vmem:[%s596_s3] sm:$0xff]   ;;  %s460_s3 = smov [#allocation3]  }
  0x15   :  { %416 = vmatprep.mubr.msk.bf16.mxu1 %vm239_vm1, %v429_v26  ;;  %s366_s18 = sshll.u32 %s460_s3, 4  ;;  %s367_s18 = int_to_ptr.vmem [resolvable:$true] %s366_s18 }
  0x16   :  { %405 = vmatmul.mubr.msk.bf16.gmra.mrb[4].mxu0 %vm108_vm0, %v428_v15  ;;  %s435_s19 = scalar_lea.vmem %s367_s18, 16  ;;  %s439_s20 = scalar_lea.vmem %s367_s18, 32 }
  0x17   :  { %211 = vperm.xlu0 %423, %v205_v17   ;;  %p436_p0 = scmp.ne.s32.totalorder %s367_s18, %s435_s19  ;;  %p440_p1 = scmp.lt.s32.totalorder %s367_s18, %s367_s18 }
  0x18   :  { %216 = vperm.xlu1 %424, %v206_v18   ;;  %p441_p2 = scmp.lt.s32.totalorder %s439_s20, %s435_s19 }
  0x1a   :  { %p442_p3 = por %p441_p2, %p440_p1 }
  0x1b   :  { %221 = vperm.xlu0 %423, %v207_v19  }
  0x1c   :  { %226 = vperm.xlu1 %424, %v208_v20   ;;  %p443_p4 = pnand %p442_p3, %p436_p0 }
  0x1f   :  { %305 = vperm.xlu0 %423, %v299_v21  }
  0x20   :  { %310 = vperm.xlu1 %424, %v300_v22  }
  0x23   :  { %315 = vperm.xlu0 %423, %v301_v23  }
  0x24   :  { %320 = vperm.xlu1 %424, %v302_v24  }
  0x27   :  { %344 = vperm.xlu0 %423, %v341_v25  }
  0x84   :  { %v61_v28 = vpop.permute.xlu1 %60 }
  0x85   :  { %v51_v27 = vpop.permute.xlu0 %50 }
  0x88   :  { %v66_v30 = vpop.permute.xlu1 %65 }
  0x89   :  { %v56_v29 = vpop.permute.xlu0 %55 }
  0x8e   :  { %v71_v34 = vpop.permute.xlu0 %70 }
  0x8f   :  { %v76_v39 = vpop.permute.xlu1 %75 }
  0x92   :  { %v81_v46 = vpop.permute.xlu0 %80 }
  0x93   :  { %v86_v51 = vpop.permute.xlu1 %85 }
  0x96   :  { %v212_v0 = vpop.permute.xlu0 %211 }
  0x97   :  { %v217_v1 = vpop.permute.xlu1 %216 }
  0x9a   :  { %v222_v2 = vpop.permute.xlu0 %221 }
  0x9b   :  { %v227_v3 = vpop.permute.xlu1 %226 }
  0x9e   :  { %v306_v5 = vpop.permute.xlu0 %305 }
  0x9f   :  { %v311_v10 = vpop.permute.xlu1 %310 }
  0xa2   :  { %v316_v19 = vpop.permute.xlu0 %315 }
  0xa3   :  { %v321_v22 = vpop.permute.xlu1 %320 }
  0xe1   :  { %v402_v31 = vpop.f32.mrb[0].mxu0 }
  0xe2   :  { %v167_v32 = vadd.f32 %v402_v31, %v61_v28  ;;  %v158_v33 = vpop.f32.mrb[1].mxu0 }
  0xe3   :  { %v159_v35 = vadd.f32 %v158_v33, %v51_v27  ;;  %v403_v36 = vpop.f32.mrb[2].mxu0 }
  0xe4   :  { %v170_v37 = vadd.f32 %v403_v36, %v66_v30  ;;  %v161_v38 = vpop.f32.mrb[3].mxu0  ;;  %v191_v41 = vmax.f32 %v167_v32, 0.0  ;;  %v347_v30 = vlaneseq }
  0xe5   :  { %v162_v40 = vadd.f32 %v161_v38, %v56_v29  ;;  %v189_v43 = vmax.f32 %v159_v35, 0.0  ;;  %v345_v38 = vpop.permute.xlu0 %344 }
  0xe6   :  { %v192_v42 = vmax.f32 %v170_v37, 0.0  ;;  %v348_v33 = vshrl.u32 %v347_v30, 7 }
  0xe7   :  { %v190_v44 = vmax.f32 %v162_v40, 0.0 }
  0xe8   :  { %v202_v45 = vpack.c.bf16 %v192_v42, %v191_v41  ;;  %v349_v36 = vsub.s32 0, %v348_v33 }
  0xe9   :  { %v406_v47 = vpop.f32.mrb[4].mxu0  ;;  %v201_v48 = vpack.c.bf16 %v190_v44, %v189_v43 }
  0xea   :  { %v183_v49 = vadd.f32 %v406_v47, %v81_v46  ;;  %v174_v50 = vpop.f32.mrb[5].mxu0  ;;  %v350_v40 = vrot.slane %v345_v38, %v349_v36 }
  0xeb   :  { %v175_v52 = vadd.f32 %v174_v50, %v71_v34  ;;  %v407_v53 = vpop.f32.mrb[6].mxu0  ;;  %408 = vmatprep.subr.bf16.mxu1 %v201_v48 }
  0xec   :  { %v186_v54 = vadd.f32 %v407_v53, %v86_v51  ;;  %v177_v55 = vpop.f32.mrb[7].mxu0  ;;  %409 = vmatpush3.bf16.msra.mxu1 %v201_v48  ;;  %v195_v57 = vmax.f32 %v183_v49, 0.0 }
  0xed   :  { %v178_v56 = vadd.f32 %v177_v55, %v76_v39  ;;  %410 = vmatprep.subr.bf16.mxu1 %v202_v45  ;;  %v193_v59 = vmax.f32 %v175_v52, 0.0 }
  0xee   :  { %v196_v58 = vmax.f32 %v186_v54, 0.0 }
  0xef   :  { %v194_v60 = vmax.f32 %v178_v56, 0.0 }
  0xf0   :  { %v204_v61 = vpack.c.bf16 %v196_v58, %v195_v57  ;;  %411 = vmatpush3.bf16.msra.mxu1 %v202_v45 }
  0xf1   :  { %v203_v62 = vpack.c.bf16 %v194_v60, %v193_v59 }
  0xf3   :  { %412 = vmatprep.subr.bf16.mxu1 %v203_v62 }
  0xf4   :  { %413 = vmatpush3.bf16.msra.mxu1 %v203_v62 }
  0xf5   :  { %414 = vmatprep.subr.bf16.mxu1 %v204_v61 }
  0xf8   :  { %415 = vmatpush3.bf16.msra.mxu1 %v204_v61 }
  0xfb   :  { %417 = vmatmul.mubr.msk.bf16.vlgmr.msra.gmra.mrb[0].mxu1 %vm239_vm1, %v430_v63 }
 0x1ce   :  { %v418_v4 = vpop.f32.mrb[0].mxu1 }
 0x1cf   :  { %v289_v6 = vadd.f32 %v418_v4, %v222_v2  ;;  %v280_v7 = vpop.f32.mrb[1].mxu1 }
 0x1d0   :  { %v281_v8 = vadd.f32 %v280_v7, %v212_v0  ;;  %v419_v9 = vpop.f32.mrb[2].mxu1 }
 0x1d1   :  { %v292_v11 = vadd.f32 %v419_v9, %v227_v3  ;;  %v283_v12 = vpop.f32.mrb[3].mxu1  ;;  %v297_v13 = vmax.f32 %v289_v6, 0.0 }
 0x1d2   :  { %v295_v14 = vmax.f32 %v281_v8, 0.0  ;;  %v284_v15 = vadd.f32 %v283_v12, %v217_v1 }
 0x1d3   :  { %v298_v17 = vmax.f32 %v292_v11, 0.0  ;;  %v325_v20 = vmul.f32 %v316_v19, %v297_v13 }
 0x1d4   :  { %v323_v16 = vmul.f32 %v306_v5, %v295_v14  ;;  %v296_v18 = vmax.f32 %v284_v15, 0.0 }
 0x1d5   :  { %v326_v24 = vmul.f32 %v321_v22, %v298_v17  ;;  %v331_v27 = vsel %vm327_vm2, %v325_v20, 0.0 }
 0x1d6   :  { %v324_v21 = vmul.f32 %v311_v10, %v296_v18  ;;  %v328_v23 = vsel %vm327_vm2, %v323_v16, 0.0 }
 0x1d7   :  { %v333_v29 = vsel %vm327_vm2, %v326_v24, 0.0 }
 0x1d8   :  { %v329_v25 = vsel %vm327_vm2, %v324_v21, 0.0 }
 0x1d9   :  { %v330_v26 = vadd.f32 %v329_v25, %v328_v23 }
 0x1db   :  { %v332_v28 = vadd.f32 %v331_v27, %v330_v26 }
 0x1dd   :  { %v334_v31 = vadd.f32 %v333_v29, %v332_v28 }
 0x1df   :  { %v335_v32 = vrot.slane %v334_v31, 4 }
 0x1e1   :  { %v336_v34 = vadd.f32 %v335_v32, %v334_v31 }
 0x1e3   :  { %v337_v35 = vrot.slane %v336_v34, 2 }
 0x1e5   :  { %v338_v37 = vadd.f32 %v337_v35, %v336_v34 }
 0x1e7   :  { %v339_v39 = vrot.slane %v338_v37, 1 }
 0x1e9   :  { %v340_v41 = vadd.f32 %v339_v39, %v338_v37 }
 0x1eb   :  { %v351_v42 = vadd.f32 %v350_v40, %v340_v41 }
 0x1ed   :  { %v386_v43 = vmul.f32 -1.442695, %v351_v42 }
 0x1ef   :  { %431 = vpow2.f32 %v386_v43 }
 0x1f9   :  { %v432_v44 = vpop.eup %431 }
 0x1fa   :  { %v355_v45 = vadd.f32 1.0, %v432_v44 }
 0x1fc   :  { %433 = vrcp.f32 %v355_v45 }
 0x206   :  { %v434_v46 = vpop.eup %433 }
 0x207   :  { %359 = vst.msk [vmem:[#allocation3] sm:$0x1] %vm358_vm3, %v434_v46 }
 0x208   :  { %446 = shalt.err (!%p443_p4)
}
 0x209   :  { %s447_s23 = scalar_lea.hbm %s600_s7, 16 }
 0x20a   :  { %p448_p5 = scmp.ne.s32.totalorder %s600_s7, %s447_s23  ;;  %p451_p6 = scmp.lt.u32.totalorder %s447_s23, %s600_s7 }
 0x20c   :  { %p453_p7 = pnand %p451_p6, %p448_p5 }
 0x20e   :  { %456 = shalt.err (!%p453_p7)
}
 0x20f   :  { %369 = dma.vmem_to_hbm [thread:$0]  %s367_s18, 16, %s600_s7, [#allocation4]  }
 0x210   :  { %457 = dma.done.wait [#allocation4], 16  }
 0x211   :  { %458 = vsyncadd [#allocation4], 4294967280 }
 0x212   :  { %373 = vsyncpa [#allocation4], 1 }

</bundles_post_ra>
